<compile_context>
chip_gen: v6e
topology: v6e:2x2x1
jax: 0.10.0
libtpu: 0.0.40
codegen_flags: <defaults>
</compile_context>

<pallas_src>
import jax
import jax.numpy as jnp
from jax.experimental import pallas as pl
from jax.experimental.pallas import tpu as pltpu

latent_dim = 10
n_features = 100
n_hidden = 20

LANE = 128  # TPU lane width; all feature dims are padded to this.


def _round_up(n, m):
    return (n + m - 1) // m * m


def _pad_to(a, shape):
    pads = [(0, t - s) for s, t in zip(a.shape, shape)]
    return jnp.pad(a, pads)


def vae_kernel(
    x_ref, eps_ref,                 # (TB,128) bf16 / (TB,128) f32 (eps in lanes [10,20))
    w1_ref, b1_ref,                 # encoder Linear(features -> hidden), padded to 128
    w2_ref, b2_ref,                 # encoder head Linear(hidden -> 2*latent), padded
    w3_ref, b3_ref,                 # decoder Linear(latent -> hidden); latent rows DUPLICATED
    w4_ref, b4_ref,                 # decoder Linear(hidden -> features), padded
    recon_ref, mulv_ref,            # (TB,128) f32 outputs
):
    # ---- encoder ----
    h = jnp.dot(x_ref[...], w1_ref[...], preferred_element_type=jnp.float32) + b1_ref[...]
    h = jnp.maximum(h, 0.0)  # ReLU; padded columns stay exactly 0 (zero-padded w1/b1)

    # fused mu / log_var head: lanes [0,10)=mu, [10,20)=log_var, rest exactly 0
    mulv = jnp.dot(h.astype(jnp.bfloat16), w2_ref[...],
                   preferred_element_type=jnp.float32) + b2_ref[...]
    mulv_ref[...] = mulv  # wrapper slices mu / log_var out of this lane-dense output

    # ---- reparameterize (no narrow lane slices) ----
    # eps_ref holds eps in lanes [latent_dim, 2*latent_dim), zeros elsewhere, so:
    #   lanes [0,10)  -> mu
    #   lanes [10,20) -> eps * exp(0.5 * log_var)
    #   lanes >= 20   -> 0
    lane = jax.lax.broadcasted_iota(jnp.int32, mulv.shape, 1)
    z_full = jnp.where(lane < latent_dim, mulv, eps_ref[...] * jnp.exp(0.5 * mulv))

    # ---- decoder ----
    # w3_ref has the latent rows duplicated at rows [10,20), so
    # z_full @ w3_ref == (mu + eps*std) @ w3.
    h2 = jnp.dot(z_full.astype(jnp.bfloat16), w3_ref[...],
                 preferred_element_type=jnp.float32) + b3_ref[...]
    h2 = jnp.maximum(h2, 0.0)
    logits = jnp.dot(h2.astype(jnp.bfloat16), w4_ref[...],
                     preferred_element_type=jnp.float32) + b4_ref[...]
    # sigmoid via EUP exp + EUP approx reciprocal
    recon_ref[...] = pl.reciprocal(1.0 + jnp.exp(-logits), approx=True)


@jax.jit
def vae_forward(x, eps, params):
    """Full VAE forward in one pipelined Pallas kernel.

    x:   (B, n_features) float32
    eps: (B, latent_dim) float32  -- the randn_like noise used by reparameterize
    returns (reconstructed_x, mu, log_var) exactly like the PyTorch module.
    """
    w1, b1, w2, b2, w3, b3, w4, b4 = params
    B = x.shape[0]

    # Batch tiling: single tile for small B (rounded to 16 for bf16 sublane packing),
    # 512-row tiles (double-buffered, "parallel" across TCs) for large B.
    if B <= 512:
        TB = _round_up(B, 16)
        B_pad = TB
    else:
        TB = 512
        B_pad = _round_up(B, TB)
    grid = (B_pad // TB,)

    # ---- pad + cast everything to lane-dense shapes outside the kernel ----
    x_p = _pad_to(x, (B_pad, LANE)).astype(jnp.bfloat16)
    # place eps in the log_var lanes [latent_dim, 2*latent_dim)
    eps_p = jnp.zeros((B_pad, LANE), jnp.float32)
    eps_p = eps_p.at[:B, latent_dim:2 * latent_dim].set(eps)

    w1_p = _pad_to(w1, (LANE, LANE)).astype(jnp.bfloat16)
    b1_p = _pad_to(b1, (1, LANE))
    w2_p = _pad_to(w2, (LANE, LANE)).astype(jnp.bfloat16)
    b2_p = _pad_to(b2, (1, LANE))
    w3_dup = jnp.concatenate([w3, w3], axis=0)              # duplicate latent rows
    w3_p = _pad_to(w3_dup, (LANE, LANE)).astype(jnp.bfloat16)
    b3_p = _pad_to(b3, (1, LANE))
    w4_p = _pad_to(w4, (LANE, LANE)).astype(jnp.bfloat16)
    b4_p = _pad_to(b4, (1, LANE))

    act_spec = pl.BlockSpec((TB, LANE), lambda i: (i, 0))    # batch-tiled activations
    w_spec = pl.BlockSpec((LANE, LANE), lambda i: (0, 0))    # resident weights
    b_spec = pl.BlockSpec((1, LANE), lambda i: (0, 0))       # resident biases

    recon_p, mulv = pl.pallas_call(
        vae_kernel,
        grid=grid,
        out_shape=(
            jax.ShapeDtypeStruct((B_pad, LANE), jnp.float32),   # padded reconstruction
            jax.ShapeDtypeStruct((B_pad, LANE), jnp.float32),   # fused [mu | log_var | 0]
        ),
        in_specs=[act_spec, act_spec,
                  w_spec, b_spec, w_spec, b_spec,
                  w_spec, b_spec, w_spec, b_spec],
        out_specs=(act_spec, act_spec),
        compiler_params=pltpu.CompilerParams(dimension_semantics=("parallel",)),
    )(x_p, eps_p, w1_p, b1_p, w2_p, b2_p, w3_p, b3_p, w4_p, b4_p)

    recon = recon_p[:B, :n_features]
    mu = mulv[:B, :latent_dim]
    log_var = mulv[:B, latent_dim:2 * latent_dim]
    return recon, mu, log_var


def init_params(key):
    """PyTorch nn.Linear-style init (uniform +/- 1/sqrt(fan_in)).
    Weights stored as (in, out); biases as (1, out)."""
    def linear(key, fan_in, fan_out):
        kw, kb = jax.random.split(key)
        bound = fan_in ** -0.5
        w = jax.random.uniform(kw, (fan_in, fan_out), jnp.float32, -bound, bound)
        b = jax.random.uniform(kb, (1, fan_out), jnp.float32, -bound, bound)
        return w, b

    k1, k2, k3, k4 = jax.random.split(key, 4)
    w1, b1 = linear(k1, n_features, n_hidden)
    w2, b2 = linear(k2, n_hidden, 2 * latent_dim)
    w3, b3 = linear(k3, latent_dim, n_hidden)
    w4, b4 = linear(k4, n_hidden, n_features)
    return (w1, b1, w2, b2, w3, b3, w4, b4)


def reference_forward_f32(x, eps, params):
    """Pure-JAX f32 reference of the PyTorch forward (model semantics)."""
    w1, b1, w2, b2, w3, b3, w4, b4 = params
    h = jnp.maximum(x @ w1 + b1, 0.0)
    mulv = h @ w2 + b2
    mu, log_var = mulv[:, :latent_dim], mulv[:, latent_dim:]
    z = eps * jnp.exp(0.5 * log_var) + mu
    h2 = jnp.maximum(z @ w3 + b3, 0.0)
    recon = jax.nn.sigmoid(h2 @ w4 + b4)
    return recon, mu, log_var


def reference_forward_bf16(x, eps, params):
    """Reference mirroring the kernel's bf16 dots and split (mu, eps*std) decoder dot."""
    w1, b1, w2, b2, w3, b3, w4, b4 = params
    bf = jnp.bfloat16
    dot = lambda a, b: jnp.dot(a.astype(bf), b.astype(bf),
                               preferred_element_type=jnp.float32)
    h = jnp.maximum(dot(x, w1) + b1, 0.0)
    mulv = dot(h, w2) + b2
    mu, log_var = mulv[:, :latent_dim], mulv[:, latent_dim:]
    z_parts = jnp.concatenate([mu, eps * jnp.exp(0.5 * log_var)], axis=1)
    w3_dup = jnp.concatenate([w3, w3], axis=0)
    h2 = jnp.maximum(dot(z_parts, w3_dup) + b3, 0.0)
    recon = jax.nn.sigmoid(dot(h2, w4) + b4)
    return recon, mu, log_var


if __name__ == "__main__":
    key = jax.random.PRNGKey(0)
    k_params, k_x, k_eps = jax.random.split(key, 3)

    B = 8
    params = init_params(k_params)
    x = jax.random.uniform(k_x, (B, n_features), jnp.float32)      # data in [0, 1)
    eps = jax.random.normal(k_eps, (B, latent_dim), jnp.float32)   # reparam noise

    recon, mu, log_var = vae_forward(x, eps, params)
    jax.block_until_ready((recon, mu, log_var))

    assert recon.shape == (B, n_features)
    assert mu.shape == (B, latent_dim)
    assert log_var.shape == (B, latent_dim)

    # Tight check against a reference that mirrors the kernel's bf16 math.
    r_bf, m_bf, lv_bf = reference_forward_bf16(x, eps, params)
    assert jnp.allclose(recon, r_bf, atol=2e-3, rtol=2e-3)
    assert jnp.allclose(mu, m_bf, atol=2e-3, rtol=2e-3)
    assert jnp.allclose(log_var, lv_bf, atol=2e-3, rtol=2e-3)

    # Looser check against the full-f32 PyTorch-semantics reference.
    r_f32, m_f32, lv_f32 = reference_forward_f32(x, eps, params)
    assert jnp.allclose(recon, r_f32, atol=5e-2, rtol=5e-2)
    assert jnp.allclose(mu, m_f32, atol=5e-2, rtol=5e-2)
    assert jnp.allclose(log_var, lv_f32, atol=5e-2, rtol=5e-2)

    print("KERNEL_OK")
</pallas_src>

<mosaic_0001>
module attributes {stable_mosaic.version = 11 : i64} {
  func.func @vae_kernel(%arg0: i32, %arg1: memref<16x128xbf16, #tpu.memory_space<vmem>>, %arg2: memref<16x128xf32, #tpu.memory_space<vmem>>, %arg3: memref<128x128xbf16, #tpu.memory_space<vmem>>, %arg4: memref<1x128xf32, #tpu.memory_space<vmem>>, %arg5: memref<128x128xbf16, #tpu.memory_space<vmem>>, %arg6: memref<1x128xf32, #tpu.memory_space<vmem>>, %arg7: memref<128x128xbf16, #tpu.memory_space<vmem>>, %arg8: memref<1x128xf32, #tpu.memory_space<vmem>>, %arg9: memref<128x128xbf16, #tpu.memory_space<vmem>>, %arg10: memref<1x128xf32, #tpu.memory_space<vmem>>, %arg11: memref<16x128xf32, #tpu.memory_space<vmem>>, %arg12: memref<16x128xf32, #tpu.memory_space<vmem>>) attributes {dimension_semantics = [#tpu.dimension_semantics<parallel>], iteration_bounds = array<i64: 1>, scalar_prefetch = 0 : i64, scratch_operands = 0 : i64, tpu.core_type = #tpu.core_type<tc>, window_params = [{transform_indices = @transform_0, window_bounds = array<i64: 16, 128>}, {transform_indices = @transform_1, window_bounds = array<i64: 16, 128>}, {pipeline_mode = #tpu.pipeline_mode<synchronous>, transform_indices = @transform_2, window_bounds = array<i64: 128, 128>}, {pipeline_mode = #tpu.pipeline_mode<synchronous>, transform_indices = @transform_3, window_bounds = array<i64: 1, 128>}, {pipeline_mode = #tpu.pipeline_mode<synchronous>, transform_indices = @transform_4, window_bounds = array<i64: 128, 128>}, {pipeline_mode = #tpu.pipeline_mode<synchronous>, transform_indices = @transform_5, window_bounds = array<i64: 1, 128>}, {pipeline_mode = #tpu.pipeline_mode<synchronous>, transform_indices = @transform_6, window_bounds = array<i64: 128, 128>}, {pipeline_mode = #tpu.pipeline_mode<synchronous>, transform_indices = @transform_7, window_bounds = array<i64: 1, 128>}, {pipeline_mode = #tpu.pipeline_mode<synchronous>, transform_indices = @transform_8, window_bounds = array<i64: 128, 128>}, {pipeline_mode = #tpu.pipeline_mode<synchronous>, transform_indices = @transform_9, window_bounds = array<i64: 1, 128>}, {transform_indices = @transform_10, window_bounds = array<i64: 16, 128>}, {transform_indices = @transform_11, window_bounds = array<i64: 16, 128>}]} {
    %c0 = arith.constant 0 : index
    %c0_0 = arith.constant 0 : index
    %0 = vector.load %arg1[%c0, %c0_0] : memref<16x128xbf16, #tpu.memory_space<vmem>>, vector<16x128xbf16>
    %c0_1 = arith.constant 0 : index
    %c0_2 = arith.constant 0 : index
    %1 = vector.load %arg3[%c0_1, %c0_2] : memref<128x128xbf16, #tpu.memory_space<vmem>>, vector<128x128xbf16>
    %cst = arith.constant dense<0.000000e+00> : vector<16x128xf32>
    %2 = tpu.matmul %0, %1, %cst {dimension_numbers = #tpu.dot_dimension_numbers<[1], [0], [0], [1], [0, 0, 1, 1], [], []>} : vector<16x128xbf16>, vector<128x128xbf16>, vector<16x128xf32> -> vector<16x128xf32>
    %c0_3 = arith.constant 0 : index
    %c0_4 = arith.constant 0 : index
    %3 = vector.load %arg4[%c0_3, %c0_4] : memref<1x128xf32, #tpu.memory_space<vmem>>, vector<1x128xf32>
    %4 = vector.broadcast %3 : vector<1x128xf32> to vector<16x128xf32>
    %5 = arith.addf %2, %4 : vector<16x128xf32>
    %cst_5 = arith.constant 0.000000e+00 : f32
    %6 = vector.broadcast %cst_5 : f32 to vector<16x128xf32>
    %7 = arith.maximumf %5, %6 : vector<16x128xf32>
    %8 = arith.truncf %7 : vector<16x128xf32> to vector<16x128xbf16>
    %c0_6 = arith.constant 0 : index
    %c0_7 = arith.constant 0 : index
    %9 = vector.load %arg5[%c0_6, %c0_7] : memref<128x128xbf16, #tpu.memory_space<vmem>>, vector<128x128xbf16>
    %cst_8 = arith.constant dense<0.000000e+00> : vector<16x128xf32>
    %10 = tpu.matmul %8, %9, %cst_8 {dimension_numbers = #tpu.dot_dimension_numbers<[1], [0], [0], [1], [0, 0, 1, 1], [], []>} : vector<16x128xbf16>, vector<128x128xbf16>, vector<16x128xf32> -> vector<16x128xf32>
    %c0_9 = arith.constant 0 : index
    %c0_10 = arith.constant 0 : index
    %11 = vector.load %arg6[%c0_9, %c0_10] : memref<1x128xf32, #tpu.memory_space<vmem>>, vector<1x128xf32>
    %12 = vector.broadcast %11 : vector<1x128xf32> to vector<16x128xf32>
    %13 = arith.addf %10, %12 : vector<16x128xf32>
    %c0_11 = arith.constant 0 : index
    %c0_12 = arith.constant 0 : index
    %14 = vector.load %arg12[%c0_11, %c0_12] : memref<16x128xf32, #tpu.memory_space<vmem>>, vector<16x128xf32>
    tpu.vector_store %arg12[%c0_11, %c0_12], %13 {strides = array<i32>} : memref<16x128xf32, #tpu.memory_space<vmem>>, vector<16x128xf32>,
    %15 = tpu.iota {dimensions = array<i32: 1>} : vector<16x128xi32>
    %c10_i32 = arith.constant 10 : i32
    %16 = vector.broadcast %c10_i32 : i32 to vector<16x128xi32>
    %17 = arith.cmpi slt, %15, %16 : vector<16x128xi32>
    %c0_13 = arith.constant 0 : index
    %c0_14 = arith.constant 0 : index
    %18 = vector.load %arg2[%c0_13, %c0_14] : memref<16x128xf32, #tpu.memory_space<vmem>>, vector<16x128xf32>
    %cst_15 = arith.constant 5.000000e-01 : f32
    %19 = vector.broadcast %cst_15 : f32 to vector<16x128xf32>
    %20 = arith.mulf %19, %13 : vector<16x128xf32>
    %21 = math.exp %20 : vector<16x128xf32>
    %22 = arith.mulf %18, %21 : vector<16x128xf32>
    %23 = arith.select %17, %13, %22 : vector<16x128xi1>, vector<16x128xf32>
    %24 = arith.truncf %23 : vector<16x128xf32> to vector<16x128xbf16>
    %c0_16 = arith.constant 0 : index
    %c0_17 = arith.constant 0 : index
    %25 = vector.load %arg7[%c0_16, %c0_17] : memref<128x128xbf16, #tpu.memory_space<vmem>>, vector<128x128xbf16>
    %cst_18 = arith.constant dense<0.000000e+00> : vector<16x128xf32>
    %26 = tpu.matmul %24, %25, %cst_18 {dimension_numbers = #tpu.dot_dimension_numbers<[1], [0], [0], [1], [0, 0, 1, 1], [], []>} : vector<16x128xbf16>, vector<128x128xbf16>, vector<16x128xf32> -> vector<16x128xf32>
    %c0_19 = arith.constant 0 : index
    %c0_20 = arith.constant 0 : index
    %27 = vector.load %arg8[%c0_19, %c0_20] : memref<1x128xf32, #tpu.memory_space<vmem>>, vector<1x128xf32>
    %28 = vector.broadcast %27 : vector<1x128xf32> to vector<16x128xf32>
    %29 = arith.addf %26, %28 : vector<16x128xf32>
    %cst_21 = arith.constant 0.000000e+00 : f32
    %30 = vector.broadcast %cst_21 : f32 to vector<16x128xf32>
    %31 = arith.maximumf %29, %30 : vector<16x128xf32>
    %32 = arith.truncf %31 : vector<16x128xf32> to vector<16x128xbf16>
    %c0_22 = arith.constant 0 : index
    %c0_23 = arith.constant 0 : index
    %33 = vector.load %arg9[%c0_22, %c0_23] : memref<128x128xbf16, #tpu.memory_space<vmem>>, vector<128x128xbf16>
    %cst_24 = arith.constant dense<0.000000e+00> : vector<16x128xf32>
    %34 = tpu.matmul %32, %33, %cst_24 {dimension_numbers = #tpu.dot_dimension_numbers<[1], [0], [0], [1], [0, 0, 1, 1], [], []>} : vector<16x128xbf16>, vector<128x128xbf16>, vector<16x128xf32> -> vector<16x128xf32>
    %c0_25 = arith.constant 0 : index
    %c0_26 = arith.constant 0 : index
    %35 = vector.load %arg10[%c0_25, %c0_26] : memref<1x128xf32, #tpu.memory_space<vmem>>, vector<1x128xf32>
    %36 = vector.broadcast %35 : vector<1x128xf32> to vector<16x128xf32>
    %37 = arith.addf %34, %36 : vector<16x128xf32>
    %cst_27 = arith.constant 0.000000e+00 : f32
    %38 = vector.broadcast %cst_27 : f32 to vector<16x128xf32>
    %39 = arith.subf %38, %37 : vector<16x128xf32>
    %40 = math.exp %39 : vector<16x128xf32>
    %cst_28 = arith.constant 1.000000e+00 : f32
    %41 = vector.broadcast %cst_28 : f32 to vector<16x128xf32>
    %42 = arith.addf %41, %40 : vector<16x128xf32>
    %43 = tpu.reciprocal %42 {approx = true} : vector<16x128xf32> -> vector<16x128xf32>
    %c0_29 = arith.constant 0 : index
    %c0_30 = arith.constant 0 : index
    %44 = vector.load %arg11[%c0_29, %c0_30] : memref<16x128xf32, #tpu.memory_space<vmem>>, vector<16x128xf32>
    tpu.vector_store %arg11[%c0_29, %c0_30], %43 {strides = array<i32>} : memref<16x128xf32, #tpu.memory_space<vmem>>, vector<16x128xf32>,
    return
  }
  func.func @transform_0(%arg0: i32) -> (i32, i32) {
    %c0_i32 = arith.constant 0 : i32
    %c0_i32_0 = arith.constant 0 : i32
    return %arg0, %c0_i32 : i32, i32
  }
  func.func @transform_1(%arg0: i32) -> (i32, i32) {
    %c0_i32 = arith.constant 0 : i32
    %c0_i32_0 = arith.constant 0 : i32
    return %arg0, %c0_i32 : i32, i32
  }
  func.func @transform_2(%arg0: i32) -> (i32, i32) {
    %c0_i32 = arith.constant 0 : i32
    %c0_i32_0 = arith.constant 0 : i32
    %c0_i32_1 = arith.constant 0 : i32
    return %c0_i32, %c0_i32_0 : i32, i32
  }
  func.func @transform_3(%arg0: i32) -> (i32, i32) {
    %c0_i32 = arith.constant 0 : i32
    %c0_i32_0 = arith.constant 0 : i32
    %c0_i32_1 = arith.constant 0 : i32
    return %c0_i32, %c0_i32_0 : i32, i32
  }
  func.func @transform_4(%arg0: i32) -> (i32, i32) {
    %c0_i32 = arith.constant 0 : i32
    %c0_i32_0 = arith.constant 0 : i32
    %c0_i32_1 = arith.constant 0 : i32
    return %c0_i32, %c0_i32_0 : i32, i32
  }
  func.func @transform_5(%arg0: i32) -> (i32, i32) {
    %c0_i32 = arith.constant 0 : i32
    %c0_i32_0 = arith.constant 0 : i32
    %c0_i32_1 = arith.constant 0 : i32
    return %c0_i32, %c0_i32_0 : i32, i32
  }
  func.func @transform_6(%arg0: i32) -> (i32, i32) {
    %c0_i32 = arith.constant 0 : i32
    %c0_i32_0 = arith.constant 0 : i32
    %c0_i32_1 = arith.constant 0 : i32
    return %c0_i32, %c0_i32_0 : i32, i32
  }
  func.func @transform_7(%arg0: i32) -> (i32, i32) {
    %c0_i32 = arith.constant 0 : i32
    %c0_i32_0 = arith.constant 0 : i32
    %c0_i32_1 = arith.constant 0 : i32
    return %c0_i32, %c0_i32_0 : i32, i32
  }
  func.func @transform_8(%arg0: i32) -> (i32, i32) {
    %c0_i32 = arith.constant 0 : i32
    %c0_i32_0 = arith.constant 0 : i32
    %c0_i32_1 = arith.constant 0 : i32
    return %c0_i32, %c0_i32_0 : i32, i32
  }
  func.func @transform_9(%arg0: i32) -> (i32, i32) {
    %c0_i32 = arith.constant 0 : i32
    %c0_i32_0 = arith.constant 0 : i32
    %c0_i32_1 = arith.constant 0 : i32
    return %c0_i32, %c0_i32_0 : i32, i32
  }
  func.func @transform_10(%arg0: i32) -> (i32, i32) {
    %c0_i32 = arith.constant 0 : i32
    %c0_i32_0 = arith.constant 0 : i32
    return %arg0, %c0_i32 : i32, i32
  }
  func.func @transform_11(%arg0: i32) -> (i32, i32) {
    %c0_i32 = arith.constant 0 : i32
    %c0_i32_0 = arith.constant 0 : i32
    return %arg0, %c0_i32 : i32, i32
  }
}

</mosaic_0001>

<bundles_post_ra>
// kernel: vae_forward.1
= control target key start
LH: loop header
LB: loop body
LE: loop exit
PB: predicated region body
PF: predicated region fallthrough
CT: control target
= control target key end

     0   :  { %v738_v0 = vmov 0.0   ;;  %vm739_vm0 = vmmov 0   ;;  %v275_v52 = vlaneseq  ;;  %s969_s2 = inlined_call_operand.vmem [shape: bf16[128,128], index: 2, kind: input, shape index: {}]   ;;  %s970_s4 = inlined_call_operand.vmem [shape: bf16[128,128], index: 4, kind: input, shape index: {}]   ;;  %s971_s0 = inlined_call_operand.vmem [shape: bf16[16,128], index: 0, kind: input, shape index: {}]   ;;  %s972_s6 = inlined_call_operand.vmem [shape: bf16[128,128], index: 6, kind: input, shape index: {}]   ;;  %s973_s3 = inlined_call_operand.vmem [shape: f32[1,128], index: 3, kind: input, shape index: {}]   ;;  %s974_s8 = inlined_call_operand.vmem [shape: bf16[128,128], index: 8, kind: input, shape index: {}]   ;;  %s975_s5 = inlined_call_operand.vmem [shape: f32[1,128], index: 5, kind: input, shape index: {}]   ;;  %s976_s11 = inlined_call_operand.vmem [shape: f32[16,128], index: 11, kind: output, shape index: {1}]   ;;  %s977_s1 = inlined_call_operand.vmem [shape: f32[16,128], index: 1, kind: input, shape index: {}]   ;;  %s978_s7 = inlined_call_operand.vmem [shape: f32[1,128], index: 7, kind: input, shape index: {}]   ;;  %s979_s9 = inlined_call_operand.vmem [shape: f32[1,128], index: 9, kind: input, shape index: {}]   ;;  %s980_s10 = inlined_call_operand.vmem [shape: f32[16,128], index: 10, kind: output, shape index: {0}]  }
   0x1   :  { %611 = vmatprep.subr.bf16.mxu0 %v738_v0  ;;  %v693_v1 = vld [vmem:[%s969_s2 + $0x38] sm:$0xff]   ;;  %627 = vmatprep.mubr.msk.bf16.mxu0 %vm739_vm0, %v738_v0  ;;  %v694_v2 = vld [vmem:[%s969_s2 + $0x30] sm:$0xff]   ;;  %v695_v3 = vld [vmem:[%s969_s2 + $0x28] sm:$0xff]  }
   0x2   :  { %631 = vmatprep.subr.bf16.mxu1 %v738_v0  ;;  %647 = vmatprep.mubr.msk.bf16.mxu1 %vm739_vm0, %v738_v0  ;;  %v702_v4 = vld [vmem:[%s970_s4 + $0x38] sm:$0xff]   ;;  %v696_v5 = vld [vmem:[%s969_s2 + $0x20] sm:$0xff]   ;;  %v703_v6 = vld [vmem:[%s970_s4 + $0x30] sm:$0xff]   ;;  %v276_v54 = vand.u32 127, %v275_v52 }
   0x3   :  { %612 = vmatpush3.bf16.msra.mxu0 %v693_v1  ;;  %632 = vmatpush3.bf16.msra.mxu1 %v702_v4  ;;  %v697_v7 = vld [vmem:[%s969_s2 + $0x18] sm:$0xff]   ;;  %v704_v8 = vld [vmem:[%s970_s4 + $0x28] sm:$0xff]   ;;  %v698_v9 = vld [vmem:[%s969_s2 + $0x10] sm:$0xff]  }
   0x4   :  { %613 = vmatprep.subr.bf16.mxu0 %v738_v0  ;;  %633 = vmatprep.subr.bf16.mxu1 %v738_v0  ;;  %v705_v10 = vld [vmem:[%s970_s4 + $0x20] sm:$0xff]   ;;  %v699_v11 = vld [vmem:[%s969_s2 + $0x8] sm:$0xff]   ;;  %v706_v12 = vld [vmem:[%s970_s4 + $0x18] sm:$0xff]   ;;  %vm277_vm1 = vcmp.lt.s32.totalorder %v276_v54, 10 }
   0x5   :  { %v700_v13 = vld [vmem:[%s969_s2] sm:$0xff]   ;;  %v707_v15 = vld [vmem:[%s970_s4 + $0x10] sm:$0xff]   ;;  %v708_v16 = vld [vmem:[%s970_s4 + $0x8] sm:$0xff]  }
   0x6   :  { %v701_v14 = vld [vmem:[%s971_s0] sm:$0xff]   ;;  %v710_v18 = vld [vmem:[%s972_s6 + $0x38] sm:$0xff]   ;;  %v711_v29 = vld [vmem:[%s972_s6 + $0x30] sm:$0xff]  }
   0x7   :  { %614 = vmatpush3.bf16.msra.mxu0 %v694_v2  ;;  %634 = vmatpush3.bf16.msra.mxu1 %v703_v6  ;;  %v709_v17 = vld [vmem:[%s970_s4] sm:$0xff]   ;;  %v712_v30 = vld [vmem:[%s972_s6 + $0x28] sm:$0xff]   ;;  %v714_v32 = vld [vmem:[%s972_s6 + $0x18] sm:$0xff]  }
   0x8   :  { %615 = vmatprep.subr.bf16.mxu0 %v738_v0  ;;  %635 = vmatprep.subr.bf16.mxu1 %v738_v0  ;;  %v538_v19 = vld [vmem:[%s973_s3] ss:$0 sm:$0xff]  ;;  %v715_v33 = vld [vmem:[%s972_s6 + $0x10] sm:$0xff]   ;;  %v716_v34 = vld [vmem:[%s972_s6 + $0x8] sm:$0xff]  }
   0x9   :  { %v713_v31 = vld [vmem:[%s972_s6 + $0x20] sm:$0xff]   ;;  %v718_v36 = vld [vmem:[%s974_s8 + $0x38] sm:$0xff]   ;;  %v719_v37 = vld [vmem:[%s974_s8 + $0x30] sm:$0xff]  }
   0xa   :  { %v717_v35 = vld [vmem:[%s972_s6] sm:$0xff]   ;;  %v720_v38 = vld [vmem:[%s974_s8 + $0x28] sm:$0xff]   ;;  %v722_v40 = vld [vmem:[%s974_s8 + $0x18] sm:$0xff]  }
   0xb   :  { %616 = vmatpush3.bf16.msra.mxu0 %v695_v3  ;;  %636 = vmatpush3.bf16.msra.mxu1 %v704_v8  ;;  %v721_v39 = vld [vmem:[%s974_s8 + $0x20] sm:$0xff]   ;;  %v279_v56 = vld [vmem:[%s977_s1 + $0x8] sm:$0xff]  ;;  %v723_v63 = vld [vmem:[%s974_s8 + $0x10] sm:$0xff]  }
   0xc   :  { %617 = vmatprep.subr.bf16.mxu0 %v738_v0  ;;  %637 = vmatprep.subr.bf16.mxu1 %v738_v0  ;;  %v548_v41 = vld [vmem:[%s975_s5] ss:$0 sm:$0xff]  ;;  %v724_v1 = vld [vmem:[%s974_s8 + $0x8] sm:$0xff]  }
   0xd   :  { %v278_v55 = vld [vmem:[%s977_s1] sm:$0xff] }
   0xe   :  { %v725_v2 = vld [vmem:[%s974_s8] sm:$0xff]  }
   0xf   :  { %618 = vmatpush3.bf16.msra.mxu0 %v696_v5  ;;  %638 = vmatpush3.bf16.msra.mxu1 %v705_v10  ;;  %v557_v3 = vld [vmem:[%s978_s7] ss:$0 sm:$0xff] }
  0x10   :  { %619 = vmatprep.subr.bf16.mxu0 %v738_v0  ;;  %639 = vmatprep.subr.bf16.mxu1 %v738_v0 }
  0x13   :  { %620 = vmatpush3.bf16.msra.mxu0 %v697_v7  ;;  %640 = vmatpush3.bf16.msra.mxu1 %v706_v12 }
  0x14   :  { %621 = vmatprep.subr.bf16.mxu0 %v738_v0  ;;  %641 = vmatprep.subr.bf16.mxu1 %v738_v0 }
  0x17   :  { %622 = vmatpush3.bf16.msra.mxu0 %v698_v9  ;;  %642 = vmatpush3.bf16.msra.mxu1 %v707_v15 }
  0x18   :  { %623 = vmatprep.subr.bf16.mxu0 %v738_v0  ;;  %643 = vmatprep.subr.bf16.mxu1 %v738_v0 }
  0x1b   :  { %624 = vmatpush3.bf16.msra.mxu0 %v699_v11  ;;  %644 = vmatpush3.bf16.msra.mxu1 %v708_v16 }
  0x1c   :  { %625 = vmatprep.subr.bf16.mxu0 %v738_v0  ;;  %645 = vmatprep.subr.bf16.mxu1 %v738_v0 }
  0x1f   :  { %626 = vmatpush3.bf16.msra.mxu0 %v700_v13  ;;  %646 = vmatpush3.bf16.msra.mxu1 %v709_v17 }
  0x20   :  { %651 = vmatprep.subr.bf16.mxu0 %v738_v0  ;;  %671 = vmatprep.subr.bf16.mxu1 %v738_v0 }
  0x22   :  { %628 = vmatmul.mubr.bf16.vlgmr.msra.gmra.mxu0 %v701_v14 }
  0x23   :  { %667 = vmatprep.mubr.msk.bf16.mxu0 %vm739_vm0, %v738_v0  ;;  %652 = vmatpush3.bf16.msra.mxu0 %v710_v18 }
  0x24   :  { %653 = vmatprep.subr.bf16.mxu0 %v738_v0 }
  0x27   :  { %654 = vmatpush3.bf16.msra.mxu0 %v711_v29 }
  0x28   :  { %655 = vmatprep.subr.bf16.mxu0 %v738_v0 }
  0x2b   :  { %656 = vmatpush3.bf16.msra.mxu0 %v712_v30 }
  0x2c   :  { %657 = vmatprep.subr.bf16.mxu0 %v738_v0 }
  0x2f   :  { %658 = vmatpush3.bf16.msra.mxu0 %v713_v31 }
  0x30   :  { %659 = vmatprep.subr.bf16.mxu0 %v738_v0 }
  0x33   :  { %660 = vmatpush3.bf16.msra.mxu0 %v714_v32 }
  0x34   :  { %661 = vmatprep.subr.bf16.mxu0 %v738_v0 }
  0x37   :  { %662 = vmatpush3.bf16.msra.mxu0 %v715_v33 }
  0x38   :  { %663 = vmatprep.subr.bf16.mxu0 %v738_v0 }
  0x3b   :  { %664 = vmatpush3.bf16.msra.mxu0 %v716_v34 }
  0x3c   :  { %665 = vmatprep.subr.bf16.mxu0 %v738_v0 }
  0x3f   :  { %666 = vmatpush3.bf16.msra.mxu0 %v717_v35 }
  0xe2   :  { %v151_v20 = vpop.f32.mrf.mxu0 }
  0xe3   :  { %v152_v22 = vadd.f32 %v538_v19, %v151_v20 }
  0xe4   :  { %v629_v21 = vpop.f32.mrf.mxu0 }
  0xe5   :  { %v158_v26 = vmax.f32 %v152_v22, 0.0 }
  0xe6   :  { %v154_v23 = vpop.f32.mrf.mxu0 }
  0xe7   :  { %v155_v24 = vadd.f32 %v538_v19, %v154_v23 }
  0xe8   :  { %v630_v25 = vpop.f32.mrf.mxu0 }
  0xe9   :  { %v159_v27 = vmax.f32 %v155_v24, 0.0 }
  0xeb   :  { %v160_v28 = vpack.c.bf16 %v159_v27, %v158_v26 }
  0xed   :  { %648 = vmatmul.mubr.bf16.vlgmr.msra.gmra.mxu1 %v160_v28 }
  0xee   :  { %687 = vmatprep.mubr.msk.bf16.mxu1 %vm739_vm0, %v738_v0  ;;  %672 = vmatpush3.bf16.msra.mxu1 %v718_v36 }
  0xef   :  { %673 = vmatprep.subr.bf16.mxu1 %v738_v0 }
  0xf2   :  { %674 = vmatpush3.bf16.msra.mxu1 %v719_v37 }
  0xf3   :  { %675 = vmatprep.subr.bf16.mxu1 %v738_v0 }
  0xf6   :  { %676 = vmatpush3.bf16.msra.mxu1 %v720_v38 }
  0xf7   :  { %677 = vmatprep.subr.bf16.mxu1 %v738_v0 }
  0xfa   :  { %678 = vmatpush3.bf16.msra.mxu1 %v721_v39 }
  0xfb   :  { %679 = vmatprep.subr.bf16.mxu1 %v738_v0 }
  0xfe   :  { %680 = vmatpush3.bf16.msra.mxu1 %v722_v40 }
  0xff   :  { %681 = vmatprep.subr.bf16.mxu1 %v738_v0 }
 0x102   :  { %682 = vmatpush3.bf16.msra.mxu1 %v723_v63 }
 0x103   :  { %683 = vmatprep.subr.bf16.mxu1 %v738_v0 }
 0x106   :  { %684 = vmatpush3.bf16.msra.mxu1 %v724_v1 }
 0x107   :  { %685 = vmatprep.subr.bf16.mxu1 %v738_v0  ;;  %v566_v0 = vld [vmem:[%s979_s9] ss:$0 sm:$0xff] }
 0x10a   :  { %686 = vmatpush3.bf16.msra.mxu1 %v725_v2 }
 0x1ad   :  { %v266_v42 = vpop.f32.mrf.mxu1 }
 0x1ae   :  { %v267_v43 = vadd.f32 %v548_v41, %v266_v42 }
 0x1af   :  { %v649_v44 = vpop.f32.mrf.mxu1 }
 0x1b0   :  { %273 = vst [vmem:[%s976_s11] sm:$0xff] %v267_v43  ;;  %v280_v45 = vmul.f32 0.5, %v267_v43 }
 0x1b1   :  { %v269_v46 = vpop.f32.mrf.mxu1 }
 0x1b2   :  { %v282_v47 = vmul.f32 1.442695, %v280_v45  ;;  %v270_v48 = vadd.f32 %v548_v41, %v269_v46 }
 0x1b3   :  { %v650_v49 = vpop.f32.mrf.mxu1 }
 0x1b4   :  { %726 = vpow2.f32 %v282_v47  ;;  %274 = vst [vmem:[%s976_s11 + $0x8] sm:$0xff] %v270_v48  ;;  %v281_v50 = vmul.f32 0.5, %v270_v48 }
 0x1b6   :  { %v284_v51 = vmul.f32 1.442695, %v281_v50 }
 0x1b8   :  { %728 = vpow2.f32 %v284_v51 }
 0x1c1   :  { %v727_v53 = vpop.eup %726 }
 0x1c2   :  { %v286_v57 = vmul.f32 %v727_v53, %v278_v55 }
 0x1c4   :  { %v288_v60 = vsel %vm277_vm1, %v267_v43, %v286_v57 }
 0x1c5   :  { %v729_v58 = vpop.eup %728 }
 0x1c6   :  { %v287_v59 = vmul.f32 %v729_v58, %v279_v56 }
 0x1c8   :  { %v289_v61 = vsel %vm277_vm1, %v270_v48, %v287_v59 }
 0x1c9   :  { %v290_v62 = vpack.c.bf16 %v289_v61, %v288_v60 }
 0x1cb   :  { %668 = vmatmul.mubr.bf16.vlgmr.msra.gmra.mxu0 %v290_v62 }
 0x28b   :  { %v396_v4 = vpop.f32.mrf.mxu0 }
 0x28c   :  { %v397_v6 = vadd.f32 %v557_v3, %v396_v4 }
 0x28d   :  { %v669_v5 = vpop.f32.mrf.mxu0 }
 0x28e   :  { %v403_v10 = vmax.f32 %v397_v6, 0.0 }
 0x28f   :  { %v399_v7 = vpop.f32.mrf.mxu0 }
 0x290   :  { %v400_v8 = vadd.f32 %v557_v3, %v399_v7 }
 0x291   :  { %v670_v9 = vpop.f32.mrf.mxu0 }
 0x292   :  { %v404_v11 = vmax.f32 %v400_v8, 0.0 }
 0x294   :  { %v405_v12 = vpack.c.bf16 %v404_v11, %v403_v10 }
 0x296   :  { %688 = vmatmul.mubr.bf16.vlgmr.msra.gmra.mxu1 %v405_v12 }
 0x356   :  { %v511_v13 = vpop.f32.mrf.mxu1 }
 0x357   :  { %v512_v14 = vadd.f32 %v566_v0, %v511_v13 }
 0x358   :  { %v689_v15 = vpop.f32.mrf.mxu1 }
 0x359   :  { %v518_v16 = vsub.f32 0.0, %v512_v14 }
 0x35a   :  { %v514_v17 = vpop.f32.mrf.mxu1 }
 0x35b   :  { %v520_v18 = vmul.f32 1.442695, %v518_v16  ;;  %v515_v19 = vadd.f32 %v566_v0, %v514_v17 }
 0x35c   :  { %v690_v20 = vpop.f32.mrf.mxu1 }
 0x35d   :  { %730 = vpow2.f32 %v520_v18  ;;  %v519_v21 = vsub.f32 0.0, %v515_v19 }
 0x35f   :  { %v522_v22 = vmul.f32 1.442695, %v519_v21 }
 0x361   :  { %732 = vpow2.f32 %v522_v22 }
 0x36a   :  { %v731_v23 = vpop.eup %730 }
 0x36b   :  { %v524_v24 = vadd.f32 1.0, %v731_v23 }
 0x36d   :  { %734 = vrcp.f32 %v524_v24 }
 0x36e   :  { %v733_v25 = vpop.eup %732 }
 0x36f   :  { %v525_v26 = vadd.f32 1.0, %v733_v25 }
 0x371   :  { %736 = vrcp.f32 %v525_v26 }
 0x37a   :  { %v735_v27 = vpop.eup %734 }
 0x37b   :  { %528 = vst [vmem:[%s980_s10] sm:$0xff] %v735_v27 }
 0x37e   :  { %v737_v28 = vpop.eup %736 }
 0x37f   :  { %529 = vst [vmem:[%s980_s10 + $0x8] sm:$0xff] %v737_v28 }

</bundles_post_ra>
